<compile_context>
chip_gen: v6e
topology: v6e:2x2x1
jax: 0.10.0
libtpu: 0.0.40
codegen_flags: <defaults>
</compile_context>

<pallas_src>
import functools

import jax
import jax.numpy as jnp
from jax.experimental import pallas as pl
from jax.experimental.pallas import tpu as pltpu


# ---------------------------------------------------------------------------
# Kernel
# ---------------------------------------------------------------------------
def _mha_kernel(q_ref, k_ref, v_ref, w_ref, o_ref,
                q_s, k_s, v_s, x_s, *, h, d_k, unroll_heads):
    """One batch block: fused projections + per-head attention + output proj."""
    Bb, S, D = q_ref.shape
    dt = q_ref.dtype  # compute dtype (weights were cast to this in the wrapper)

    # Weights already in (in, out) layout; W_q pre-scaled by 1/sqrt(d_k).
    wq = w_ref[0]
    wk = w_ref[1]
    wv = w_ref[2]
    wo = w_ref[3]

    # Full-width projections on the MXU, f32 accumulate, stored to VMEM scratch
    # (keeps vreg pressure low across the head loop).
    q2 = q_ref[...].reshape(Bb * S, D)
    k2 = k_ref[...].reshape(Bb * S, D)
    v2 = v_ref[...].reshape(Bb * S, D)
    q_s[...] = jnp.dot(q2, wq, preferred_element_type=jnp.float32).astype(dt)
    k_s[...] = jnp.dot(k2, wk, preferred_element_type=jnp.float32).astype(dt)
    v_s[...] = jnp.dot(v2, wv, preferred_element_type=jnp.float32).astype(dt)

    def head_body(sl):
        Qh = q_s[:, sl].reshape(Bb, S, d_k)
        Kh = k_s[:, sl].reshape(Bb, S, d_k)
        Vh = v_s[:, sl].reshape(Bb, S, d_k)

        # Scores (1/sqrt(d_k) already folded into W_q), batched over Bb.
        s = jnp.einsum("bqd,bkd->bqk", Qh, Kh,
                       preferred_element_type=jnp.float32)          # (Bb,S,S)
        s = s - jnp.max(s, axis=-1, keepdims=True)
        p = jnp.exp(s)                                               # un-normalized
        denom = jnp.sum(p, axis=-1, keepdims=True)                   # (Bb,S,1)

        # PV matmul with un-normalized probs; normalize AFTER (S*d_k multiplies
        # instead of S*S — review item).
        xh = jnp.einsum("bqk,bkd->bqd", p.astype(dt), Vh,
                        preferred_element_type=jnp.float32)          # (Bb,S,d_k)
        xh = xh * pl.reciprocal(denom, approx=True)

        # Head-concat via lane-offset store into the concat scratch.
        x_s[:, sl] = xh.reshape(Bb * S, d_k).astype(dt)

    if unroll_heads:
        for i in range(h):                    # static, fully unrolled
            head_body(slice(i * d_k, (i + 1) * d_k))
    else:
        def _body(i, carry):                  # bounded live set for large h
            head_body(pl.ds(pl.multiple_of(i * d_k, d_k), d_k))
            return carry
        jax.lax.fori_loop(0, h, _body, 0)

    # Single full-K output projection: (Bb*S, D) x (D, D) on the MXU.
    out = jnp.dot(x_s[...], wo, preferred_element_type=jnp.float32)
    o_ref[...] = out.reshape(Bb, S, D).astype(o_ref.dtype)


# ---------------------------------------------------------------------------
# VMEM accounting (double-buffering + weights + f32 intermediates included)
# ---------------------------------------------------------------------------
def _vmem_capacity_bytes():
    """Generation-aware VMEM capacity; conservative fallback (v7x = 64 MiB)."""
    try:
        info = pltpu.get_tpu_info()
        cap = getattr(info, "vmem_capacity_bytes", None)
        if cap:
            return int(cap)
    except Exception:
        pass
    return 64 * 1024 * 1024


def _per_b_bytes(S, D, itemsize):
    return (8 * S * D * itemsize      # q/k/v/out blocks, x2 double-buffered
            + 4 * S * D * itemsize    # projected Q/K/V + concat scratch
            + 8 * S * S               # f32 scores + exp(probs), one head live
            + 8 * S * D)              # f32 PV result + output-proj accumulator


def _fixed_bytes(D, itemsize):
    return 4 * D * D * itemsize       # (4, D, D) weight stack, single-buffered


def _footprint_bytes(bb, S, D, itemsize):
    return _fixed_bytes(D, itemsize) + bb * _per_b_bytes(S, D, itemsize)


def _pick_block_b(B, S, D, itemsize, budget):
    """Largest divisor of B that fits the budget AND keeps >=2-4 grid steps."""
    avail = max(budget - _fixed_bytes(D, itemsize), _per_b_bytes(S, D, itemsize))
    bb = int(max(1, min(B, avail // _per_b_bytes(S, D, itemsize))))
    if B > 1:
        # Keep the grid >= 2-4 steps: enables DMA/compute pipelining and gives
        # v7x's second TensorCore a 'parallel' program to run.
        bb = max(1, min(bb, -(-B // 4) if B >= 4 else B // 2))
    while B % bb:
        bb -= 1
    return bb


# ---------------------------------------------------------------------------
# Wrapper
# ---------------------------------------------------------------------------
def multi_head_attention(q, k, v, wq, wk, wv, wo, *, h, block_b=None):
    """q, k, v: (B, S, D); w*: (D, D) in torch (out_features, in_features) layout."""
    B, S, D = q.shape
    assert D % h == 0, "d_model must be divisible by h"
    d_k = D // h
    dt = q.dtype
    itemsize = jnp.dtype(dt).itemsize

    # Pre-transpose once to (in, out), fold 1/sqrt(d_k) into W_q, stack into one
    # constant-index DMA, and cast to the input dtype (bf16 inputs -> bf16 MXU).
    scale = 1.0 / float(d_k) ** 0.5
    w_all = jnp.stack([wq.T * scale, wk.T, wv.T, wo.T], axis=0).astype(dt)

    cap = _vmem_capacity_bytes()
    budget = int(cap * 0.45)
    if block_b is None:
        block_b = _pick_block_b(B, S, D, itemsize, budget)
    assert B % block_b == 0, "batch must be divisible by block_b"

    # Explicit scoped-VMEM limit sized from the real working set (v5e defaults
    # to only 16 MiB scoped; v7x has only 64 MiB physical).
    footprint = _footprint_bytes(block_b, S, D, itemsize)
    vmem_limit = int(min(cap * 0.9, max(footprint * 1.3, 16 * 1024 * 1024)))

    # Static unroll for small h; fori_loop (bounded live set) for large h when
    # the head slices are 128-lane aligned.
    unroll_heads = (h <= 8) or (d_k % 128 != 0)

    kernel = functools.partial(_mha_kernel, h=h, d_k=d_k,
                               unroll_heads=unroll_heads)

    x_spec = pl.BlockSpec((block_b, S, D), lambda b: (b, 0, 0))
    # Constant index map -> prefetching buys nothing: single-buffer the weights
    # (halves their VMEM footprint; biggest fixed cost on v7x).
    try:
        w_spec = pl.BlockSpec((4, D, D), lambda b: (0, 0, 0),
                              pipeline_mode=pl.Buffered(1))
    except TypeError:  # older API without pipeline_mode — fall back gracefully
        w_spec = pl.BlockSpec((4, D, D), lambda b: (0, 0, 0))

    cost = pl.CostEstimate(
        flops=8 * B * S * D * D + 4 * B * S * S * D,
        transcendentals=B * h * S * S,
        bytes_accessed=4 * B * S * D * itemsize + 4 * D * D * itemsize)

    return pl.pallas_call(
        kernel,
        out_shape=jax.ShapeDtypeStruct((B, S, D), dt),
        grid_spec=pltpu.PrefetchScalarGridSpec(
            num_scalar_prefetch=0,
            grid=(B // block_b,),
            in_specs=[x_spec, x_spec, x_spec, w_spec],
            out_specs=x_spec,
            scratch_shapes=[pltpu.VMEM((block_b * S, D), dt)] * 4,
        ),
        compiler_params=pltpu.CompilerParams(
            dimension_semantics=("parallel",),
            vmem_limit_bytes=vmem_limit),
        cost_estimate=cost,
    )(q, k, v, w_all)


# ---------------------------------------------------------------------------
# Pure-JAX reference mirroring the PyTorch forward (mask=None, eval)
# ---------------------------------------------------------------------------
def _reference(q, k, v, wq, wk, wv, wo, *, h):
    B, S, D = q.shape
    d_k = D // h
    Q = (q @ wq.T).reshape(B, S, h, d_k).transpose(0, 2, 1, 3)
    K = (k @ wk.T).reshape(B, S, h, d_k).transpose(0, 2, 1, 3)
    V = (v @ wv.T).reshape(B, S, h, d_k).transpose(0, 2, 1, 3)
    scores = (Q @ K.transpose(0, 1, 3, 2)) / jnp.sqrt(jnp.float32(d_k))
    probs = jax.nn.softmax(scores, axis=-1)
    x = probs @ V                                        # (B, h, S, d_k)
    x = x.transpose(0, 2, 1, 3).reshape(B, S, h * d_k)
    return x @ wo.T


if __name__ == "__main__":
    # Small, module-consistent shapes.
    B, S, d_model, h = 2, 8, 32, 4

    key = jax.random.PRNGKey(0)
    kq, kk, kv, kwq, kwk, kwv, kwo = jax.random.split(key, 7)

    q = jax.random.normal(kq, (B, S, d_model), dtype=jnp.float32)
    k = jax.random.normal(kk, (B, S, d_model), dtype=jnp.float32)
    v = jax.random.normal(kv, (B, S, d_model), dtype=jnp.float32)

    # Deterministic "Linear(bias=False)" weights, torch (out, in) layout.
    bound = 1.0 / jnp.sqrt(jnp.float32(d_model))
    wq = jax.random.uniform(kwq, (d_model, d_model), jnp.float32, -bound, bound)
    wk = jax.random.uniform(kwk, (d_model, d_model), jnp.float32, -bound, bound)
    wv = jax.random.uniform(kwv, (d_model, d_model), jnp.float32, -bound, bound)
    wo = jax.random.uniform(kwo, (d_model, d_model), jnp.float32, -bound, bound)

    ref = _reference(q, k, v, wq, wk, wv, wo, h=h)

    # f32 path.
    out = multi_head_attention(q, k, v, wq, wk, wv, wo, h=h)
    out = jax.block_until_ready(out)
    assert out.shape == (B, S, d_model)
    # Tolerance loosened slightly vs pure-f32 (EUP approx reciprocal in softmax).
    assert jnp.allclose(out, ref, atol=1e-2, rtol=1e-2), (
        f"f32 max abs err {jnp.max(jnp.abs(out - ref))}")

    # bf16 MXU path (weights cast in the wrapper to the input dtype).
    qb, kb, vb = (x.astype(jnp.bfloat16) for x in (q, k, v))
    out_bf16 = multi_head_attention(qb, kb, vb, wq, wk, wv, wo, h=h)
    out_bf16 = jax.block_until_ready(out_bf16)
    assert jnp.allclose(out_bf16.astype(jnp.float32), ref, atol=1e-1, rtol=1e-1), (
        f"bf16 max abs err {jnp.max(jnp.abs(out_bf16.astype(jnp.float32) - ref))}")

    print("KERNEL_OK")
</pallas_src>

<mosaic_0001>
module attributes {stable_mosaic.version = 11 : i64} {
  func.func @_mha_kernel(%arg0: i32, %arg1: memref<1x8x32xf32, #tpu.memory_space<vmem>>, %arg2: memref<1x8x32xf32, #tpu.memory_space<vmem>>, %arg3: memref<1x8x32xf32, #tpu.memory_space<vmem>>, %arg4: memref<4x32x32xf32, #tpu.memory_space<vmem>>, %arg5: memref<1x8x32xf32, #tpu.memory_space<vmem>>, %arg6: memref<8x32xf32, #tpu.memory_space<vmem>>, %arg7: memref<8x32xf32, #tpu.memory_space<vmem>>, %arg8: memref<8x32xf32, #tpu.memory_space<vmem>>, %arg9: memref<8x32xf32, #tpu.memory_space<vmem>>) attributes {dimension_semantics = [#tpu.dimension_semantics<parallel>], iteration_bounds = array<i64: 2>, scalar_prefetch = 0 : i64, scratch_operands = 4 : i64, tpu.core_type = #tpu.core_type<tc>, window_params = [{transform_indices = @transform_0, window_bounds = array<i64: 1, 8, 32>}, {transform_indices = @transform_1, window_bounds = array<i64: 1, 8, 32>}, {transform_indices = @transform_2, window_bounds = array<i64: 1, 8, 32>}, {pipeline_mode = #tpu.pipeline_mode<synchronous>, transform_indices = @transform_3, window_bounds = array<i64: 4, 32, 32>}, {transform_indices = @transform_4, window_bounds = array<i64: 1, 8, 32>}]} {
    %c0 = arith.constant 0 : index
    %c0_0 = arith.constant 0 : index
    %c0_1 = arith.constant 0 : index
    %0 = vector.load %arg4[%c0, %c0_0, %c0_1] : memref<4x32x32xf32, #tpu.memory_space<vmem>>, vector<1x32x32xf32>
    %1 = vector.shape_cast %0 : vector<1x32x32xf32> to vector<32x32xf32>
    %c1 = arith.constant 1 : index
    %c0_2 = arith.constant 0 : index
    %c0_3 = arith.constant 0 : index
    %2 = vector.load %arg4[%c1, %c0_2, %c0_3] : memref<4x32x32xf32, #tpu.memory_space<vmem>>, vector<1x32x32xf32>
    %3 = vector.shape_cast %2 : vector<1x32x32xf32> to vector<32x32xf32>
    %c2 = arith.constant 2 : index
    %c0_4 = arith.constant 0 : index
    %c0_5 = arith.constant 0 : index
    %4 = vector.load %arg4[%c2, %c0_4, %c0_5] : memref<4x32x32xf32, #tpu.memory_space<vmem>>, vector<1x32x32xf32>
    %5 = vector.shape_cast %4 : vector<1x32x32xf32> to vector<32x32xf32>
    %c3 = arith.constant 3 : index
    %c0_6 = arith.constant 0 : index
    %c0_7 = arith.constant 0 : index
    %6 = vector.load %arg4[%c3, %c0_6, %c0_7] : memref<4x32x32xf32, #tpu.memory_space<vmem>>, vector<1x32x32xf32>
    %7 = vector.shape_cast %6 : vector<1x32x32xf32> to vector<32x32xf32>
    %c0_8 = arith.constant 0 : index
    %c0_9 = arith.constant 0 : index
    %c0_10 = arith.constant 0 : index
    %8 = vector.load %arg1[%c0_8, %c0_9, %c0_10] : memref<1x8x32xf32, #tpu.memory_space<vmem>>, vector<1x8x32xf32>
    %9 = vector.shape_cast %8 : vector<1x8x32xf32> to vector<8x32xf32>
    %c0_11 = arith.constant 0 : index
    %c0_12 = arith.constant 0 : index
    %c0_13 = arith.constant 0 : index
    %10 = vector.load %arg2[%c0_11, %c0_12, %c0_13] : memref<1x8x32xf32, #tpu.memory_space<vmem>>, vector<1x8x32xf32>
    %11 = vector.shape_cast %10 : vector<1x8x32xf32> to vector<8x32xf32>
    %c0_14 = arith.constant 0 : index
    %c0_15 = arith.constant 0 : index
    %c0_16 = arith.constant 0 : index
    %12 = vector.load %arg3[%c0_14, %c0_15, %c0_16] : memref<1x8x32xf32, #tpu.memory_space<vmem>>, vector<1x8x32xf32>
    %13 = vector.shape_cast %12 : vector<1x8x32xf32> to vector<8x32xf32>
    %cst = arith.constant dense<0.000000e+00> : vector<8x32xf32>
    %14 = tpu.matmul %9, %1, %cst {dimension_numbers = #tpu.dot_dimension_numbers<[1], [0], [0], [1], [0, 0, 1, 1], [], []>} : vector<8x32xf32>, vector<32x32xf32>, vector<8x32xf32> -> vector<8x32xf32>
    %c0_17 = arith.constant 0 : index
    %c0_18 = arith.constant 0 : index
    %15 = vector.load %arg6[%c0_17, %c0_18] : memref<8x32xf32, #tpu.memory_space<vmem>>, vector<8x32xf32>
    tpu.vector_store %arg6[%c0_17, %c0_18], %14 {strides = array<i32>} : memref<8x32xf32, #tpu.memory_space<vmem>>, vector<8x32xf32>,
    %cst_19 = arith.constant dense<0.000000e+00> : vector<8x32xf32>
    %16 = tpu.matmul %11, %3, %cst_19 {dimension_numbers = #tpu.dot_dimension_numbers<[1], [0], [0], [1], [0, 0, 1, 1], [], []>} : vector<8x32xf32>, vector<32x32xf32>, vector<8x32xf32> -> vector<8x32xf32>
    %c0_20 = arith.constant 0 : index
    %c0_21 = arith.constant 0 : index
    %17 = vector.load %arg7[%c0_20, %c0_21] : memref<8x32xf32, #tpu.memory_space<vmem>>, vector<8x32xf32>
    tpu.vector_store %arg7[%c0_20, %c0_21], %16 {strides = array<i32>} : memref<8x32xf32, #tpu.memory_space<vmem>>, vector<8x32xf32>,
    %cst_22 = arith.constant dense<0.000000e+00> : vector<8x32xf32>
    %18 = tpu.matmul %13, %5, %cst_22 {dimension_numbers = #tpu.dot_dimension_numbers<[1], [0], [0], [1], [0, 0, 1, 1], [], []>} : vector<8x32xf32>, vector<32x32xf32>, vector<8x32xf32> -> vector<8x32xf32>
    %c0_23 = arith.constant 0 : index
    %c0_24 = arith.constant 0 : index
    %19 = vector.load %arg8[%c0_23, %c0_24] : memref<8x32xf32, #tpu.memory_space<vmem>>, vector<8x32xf32>
    tpu.vector_store %arg8[%c0_23, %c0_24], %18 {strides = array<i32>} : memref<8x32xf32, #tpu.memory_space<vmem>>, vector<8x32xf32>,
    %c0_25 = arith.constant 0 : index
    %c0_26 = arith.constant 0 : index
    %20 = vector.load %arg6[%c0_25, %c0_26] : memref<8x32xf32, #tpu.memory_space<vmem>>, vector<8x8xf32>
    %21 = vector.shape_cast %20 : vector<8x8xf32> to vector<1x8x8xf32>
    %c0_27 = arith.constant 0 : index
    %c0_28 = arith.constant 0 : index
    %22 = vector.load %arg7[%c0_27, %c0_28] : memref<8x32xf32, #tpu.memory_space<vmem>>, vector<8x8xf32>
    %23 = vector.shape_cast %22 : vector<8x8xf32> to vector<1x8x8xf32>
    %c0_29 = arith.constant 0 : index
    %c0_30 = arith.constant 0 : index
    %24 = vector.load %arg8[%c0_29, %c0_30] : memref<8x32xf32, #tpu.memory_space<vmem>>, vector<8x8xf32>
    %25 = vector.shape_cast %24 : vector<8x8xf32> to vector<1x8x8xf32>
    "tpu.trace_start"() <{level = 10 : i32, message = "bqd,bkd->bqk"}> : () -> ()
    %cst_31 = arith.constant dense<0.000000e+00> : vector<1x8x8xf32>
    %26 = tpu.matmul %21, %23, %cst_31 {dimension_numbers = #tpu.dot_dimension_numbers<[2], [2], [1], [1], [0, 0, 0, 1, 1, 1], [0], [0]>} : vector<1x8x8xf32>, vector<1x8x8xf32>, vector<1x8x8xf32> -> vector<1x8x8xf32>
    "tpu.trace_stop"() : () -> ()
    %cst_32 = arith.constant dense<0xFF800000> : vector<1x8xf32>
    %27 = vector.multi_reduction <maximumf>, %26, %cst_32 [2] : vector<1x8x8xf32> to vector<1x8xf32>
    %28 = vector.shape_cast %27 : vector<1x8xf32> to vector<1x8x1xf32>
    %29 = vector.broadcast %28 : vector<1x8x1xf32> to vector<1x8x8xf32>
    %30 = arith.subf %26, %29 : vector<1x8x8xf32>
    %31 = math.exp %30 : vector<1x8x8xf32>
    %cst_33 = arith.constant dense<0.000000e+00> : vector<1x8xf32>
    %32 = vector.multi_reduction <add>, %31, %cst_33 [2] : vector<1x8x8xf32> to vector<1x8xf32>
    %33 = vector.shape_cast %32 : vector<1x8xf32> to vector<1x8x1xf32>
    "tpu.trace_start"() <{level = 10 : i32, message = "bqk,bkd->bqd"}> : () -> ()
    %cst_34 = arith.constant dense<0.000000e+00> : vector<1x8x8xf32>
    %34 = tpu.matmul %31, %25, %cst_34 {dimension_numbers = #tpu.dot_dimension_numbers<[2], [1], [1], [2], [0, 0, 0, 1, 1, 2], [0], [0]>} : vector<1x8x8xf32>, vector<1x8x8xf32>, vector<1x8x8xf32> -> vector<1x8x8xf32>
    "tpu.trace_stop"() : () -> ()
    %35 = tpu.reciprocal %33 {approx = true} : vector<1x8x1xf32> -> vector<1x8x1xf32>
    %36 = vector.broadcast %35 : vector<1x8x1xf32> to vector<1x8x8xf32>
    %37 = arith.mulf %34, %36 : vector<1x8x8xf32>
    %38 = vector.shape_cast %37 : vector<1x8x8xf32> to vector<8x8xf32>
    %c0_35 = arith.constant 0 : index
    %c0_36 = arith.constant 0 : index
    %39 = vector.load %arg9[%c0_35, %c0_36] : memref<8x32xf32, #tpu.memory_space<vmem>>, vector<8x8xf32>
    tpu.vector_store %arg9[%c0_35, %c0_36], %38 {strides = array<i32>} : memref<8x32xf32, #tpu.memory_space<vmem>>, vector<8x8xf32>,
    %c0_37 = arith.constant 0 : index
    %c8 = arith.constant 8 : index
    %40 = vector.load %arg6[%c0_37, %c8] : memref<8x32xf32, #tpu.memory_space<vmem>>, vector<8x8xf32>
    %41 = vector.shape_cast %40 : vector<8x8xf32> to vector<1x8x8xf32>
    %c0_38 = arith.constant 0 : index
    %c8_39 = arith.constant 8 : index
    %42 = vector.load %arg7[%c0_38, %c8_39] : memref<8x32xf32, #tpu.memory_space<vmem>>, vector<8x8xf32>
    %43 = vector.shape_cast %42 : vector<8x8xf32> to vector<1x8x8xf32>
    %c0_40 = arith.constant 0 : index
    %c8_41 = arith.constant 8 : index
    %44 = vector.load %arg8[%c0_40, %c8_41] : memref<8x32xf32, #tpu.memory_space<vmem>>, vector<8x8xf32>
    %45 = vector.shape_cast %44 : vector<8x8xf32> to vector<1x8x8xf32>
    "tpu.trace_start"() <{level = 10 : i32, message = "bqd,bkd->bqk"}> : () -> ()
    %cst_42 = arith.constant dense<0.000000e+00> : vector<1x8x8xf32>
    %46 = tpu.matmul %41, %43, %cst_42 {dimension_numbers = #tpu.dot_dimension_numbers<[2], [2], [1], [1], [0, 0, 0, 1, 1, 1], [0], [0]>} : vector<1x8x8xf32>, vector<1x8x8xf32>, vector<1x8x8xf32> -> vector<1x8x8xf32>
    "tpu.trace_stop"() : () -> ()
    %cst_43 = arith.constant dense<0xFF800000> : vector<1x8xf32>
    %47 = vector.multi_reduction <maximumf>, %46, %cst_43 [2] : vector<1x8x8xf32> to vector<1x8xf32>
    %48 = vector.shape_cast %47 : vector<1x8xf32> to vector<1x8x1xf32>
    %49 = vector.broadcast %48 : vector<1x8x1xf32> to vector<1x8x8xf32>
    %50 = arith.subf %46, %49 : vector<1x8x8xf32>
    %51 = math.exp %50 : vector<1x8x8xf32>
    %cst_44 = arith.constant dense<0.000000e+00> : vector<1x8xf32>
    %52 = vector.multi_reduction <add>, %51, %cst_44 [2] : vector<1x8x8xf32> to vector<1x8xf32>
    %53 = vector.shape_cast %52 : vector<1x8xf32> to vector<1x8x1xf32>
    "tpu.trace_start"() <{level = 10 : i32, message = "bqk,bkd->bqd"}> : () -> ()
    %cst_45 = arith.constant dense<0.000000e+00> : vector<1x8x8xf32>
    %54 = tpu.matmul %51, %45, %cst_45 {dimension_numbers = #tpu.dot_dimension_numbers<[2], [1], [1], [2], [0, 0, 0, 1, 1, 2], [0], [0]>} : vector<1x8x8xf32>, vector<1x8x8xf32>, vector<1x8x8xf32> -> vector<1x8x8xf32>
    "tpu.trace_stop"() : () -> ()
    %55 = tpu.reciprocal %53 {approx = true} : vector<1x8x1xf32> -> vector<1x8x1xf32>
    %56 = vector.broadcast %55 : vector<1x8x1xf32> to vector<1x8x8xf32>
    %57 = arith.mulf %54, %56 : vector<1x8x8xf32>
    %58 = vector.shape_cast %57 : vector<1x8x8xf32> to vector<8x8xf32>
    %c0_46 = arith.constant 0 : index
    %c8_47 = arith.constant 8 : index
    %59 = vector.load %arg9[%c0_46, %c8_47] : memref<8x32xf32, #tpu.memory_space<vmem>>, vector<8x8xf32>
    tpu.vector_store %arg9[%c0_46, %c8_47], %58 {strides = array<i32>} : memref<8x32xf32, #tpu.memory_space<vmem>>, vector<8x8xf32>,
    %c0_48 = arith.constant 0 : index
    %c16 = arith.constant 16 : index
    %60 = vector.load %arg6[%c0_48, %c16] : memref<8x32xf32, #tpu.memory_space<vmem>>, vector<8x8xf32>
    %61 = vector.shape_cast %60 : vector<8x8xf32> to vector<1x8x8xf32>
    %c0_49 = arith.constant 0 : index
    %c16_50 = arith.constant 16 : index
    %62 = vector.load %arg7[%c0_49, %c16_50] : memref<8x32xf32, #tpu.memory_space<vmem>>, vector<8x8xf32>
    %63 = vector.shape_cast %62 : vector<8x8xf32> to vector<1x8x8xf32>
    %c0_51 = arith.constant 0 : index
    %c16_52 = arith.constant 16 : index
    %64 = vector.load %arg8[%c0_51, %c16_52] : memref<8x32xf32, #tpu.memory_space<vmem>>, vector<8x8xf32>
    %65 = vector.shape_cast %64 : vector<8x8xf32> to vector<1x8x8xf32>
    "tpu.trace_start"() <{level = 10 : i32, message = "bqd,bkd->bqk"}> : () -> ()
    %cst_53 = arith.constant dense<0.000000e+00> : vector<1x8x8xf32>
    %66 = tpu.matmul %61, %63, %cst_53 {dimension_numbers = #tpu.dot_dimension_numbers<[2], [2], [1], [1], [0, 0, 0, 1, 1, 1], [0], [0]>} : vector<1x8x8xf32>, vector<1x8x8xf32>, vector<1x8x8xf32> -> vector<1x8x8xf32>
    "tpu.trace_stop"() : () -> ()
    %cst_54 = arith.constant dense<0xFF800000> : vector<1x8xf32>
    %67 = vector.multi_reduction <maximumf>, %66, %cst_54 [2] : vector<1x8x8xf32> to vector<1x8xf32>
    %68 = vector.shape_cast %67 : vector<1x8xf32> to vector<1x8x1xf32>
    %69 = vector.broadcast %68 : vector<1x8x1xf32> to vector<1x8x8xf32>
    %70 = arith.subf %66, %69 : vector<1x8x8xf32>
    %71 = math.exp %70 : vector<1x8x8xf32>
    %cst_55 = arith.constant dense<0.000000e+00> : vector<1x8xf32>
    %72 = vector.multi_reduction <add>, %71, %cst_55 [2] : vector<1x8x8xf32> to vector<1x8xf32>
    %73 = vector.shape_cast %72 : vector<1x8xf32> to vector<1x8x1xf32>
    "tpu.trace_start"() <{level = 10 : i32, message = "bqk,bkd->bqd"}> : () -> ()
    %cst_56 = arith.constant dense<0.000000e+00> : vector<1x8x8xf32>
    %74 = tpu.matmul %71, %65, %cst_56 {dimension_numbers = #tpu.dot_dimension_numbers<[2], [1], [1], [2], [0, 0, 0, 1, 1, 2], [0], [0]>} : vector<1x8x8xf32>, vector<1x8x8xf32>, vector<1x8x8xf32> -> vector<1x8x8xf32>
    "tpu.trace_stop"() : () -> ()
    %75 = tpu.reciprocal %73 {approx = true} : vector<1x8x1xf32> -> vector<1x8x1xf32>
    %76 = vector.broadcast %75 : vector<1x8x1xf32> to vector<1x8x8xf32>
    %77 = arith.mulf %74, %76 : vector<1x8x8xf32>
    %78 = vector.shape_cast %77 : vector<1x8x8xf32> to vector<8x8xf32>
    %c0_57 = arith.constant 0 : index
    %c16_58 = arith.constant 16 : index
    %79 = vector.load %arg9[%c0_57, %c16_58] : memref<8x32xf32, #tpu.memory_space<vmem>>, vector<8x8xf32>
    tpu.vector_store %arg9[%c0_57, %c16_58], %78 {strides = array<i32>} : memref<8x32xf32, #tpu.memory_space<vmem>>, vector<8x8xf32>,
    %c0_59 = arith.constant 0 : index
    %c24 = arith.constant 24 : index
    %80 = vector.load %arg6[%c0_59, %c24] : memref<8x32xf32, #tpu.memory_space<vmem>>, vector<8x8xf32>
    %81 = vector.shape_cast %80 : vector<8x8xf32> to vector<1x8x8xf32>
    %c0_60 = arith.constant 0 : index
    %c24_61 = arith.constant 24 : index
    %82 = vector.load %arg7[%c0_60, %c24_61] : memref<8x32xf32, #tpu.memory_space<vmem>>, vector<8x8xf32>
    %83 = vector.shape_cast %82 : vector<8x8xf32> to vector<1x8x8xf32>
    %c0_62 = arith.constant 0 : index
    %c24_63 = arith.constant 24 : index
    %84 = vector.load %arg8[%c0_62, %c24_63] : memref<8x32xf32, #tpu.memory_space<vmem>>, vector<8x8xf32>
    %85 = vector.shape_cast %84 : vector<8x8xf32> to vector<1x8x8xf32>
    "tpu.trace_start"() <{level = 10 : i32, message = "bqd,bkd->bqk"}> : () -> ()
    %cst_64 = arith.constant dense<0.000000e+00> : vector<1x8x8xf32>
    %86 = tpu.matmul %81, %83, %cst_64 {dimension_numbers = #tpu.dot_dimension_numbers<[2], [2], [1], [1], [0, 0, 0, 1, 1, 1], [0], [0]>} : vector<1x8x8xf32>, vector<1x8x8xf32>, vector<1x8x8xf32> -> vector<1x8x8xf32>
    "tpu.trace_stop"() : () -> ()
    %cst_65 = arith.constant dense<0xFF800000> : vector<1x8xf32>
    %87 = vector.multi_reduction <maximumf>, %86, %cst_65 [2] : vector<1x8x8xf32> to vector<1x8xf32>
    %88 = vector.shape_cast %87 : vector<1x8xf32> to vector<1x8x1xf32>
    %89 = vector.broadcast %88 : vector<1x8x1xf32> to vector<1x8x8xf32>
    %90 = arith.subf %86, %89 : vector<1x8x8xf32>
    %91 = math.exp %90 : vector<1x8x8xf32>
    %cst_66 = arith.constant dense<0.000000e+00> : vector<1x8xf32>
    %92 = vector.multi_reduction <add>, %91, %cst_66 [2] : vector<1x8x8xf32> to vector<1x8xf32>
    %93 = vector.shape_cast %92 : vector<1x8xf32> to vector<1x8x1xf32>
    "tpu.trace_start"() <{level = 10 : i32, message = "bqk,bkd->bqd"}> : () -> ()
    %cst_67 = arith.constant dense<0.000000e+00> : vector<1x8x8xf32>
    %94 = tpu.matmul %91, %85, %cst_67 {dimension_numbers = #tpu.dot_dimension_numbers<[2], [1], [1], [2], [0, 0, 0, 1, 1, 2], [0], [0]>} : vector<1x8x8xf32>, vector<1x8x8xf32>, vector<1x8x8xf32> -> vector<1x8x8xf32>
    "tpu.trace_stop"() : () -> ()
    %95 = tpu.reciprocal %93 {approx = true} : vector<1x8x1xf32> -> vector<1x8x1xf32>
    %96 = vector.broadcast %95 : vector<1x8x1xf32> to vector<1x8x8xf32>
    %97 = arith.mulf %94, %96 : vector<1x8x8xf32>
    %98 = vector.shape_cast %97 : vector<1x8x8xf32> to vector<8x8xf32>
    %c0_68 = arith.constant 0 : index
    %c24_69 = arith.constant 24 : index
    %99 = vector.load %arg9[%c0_68, %c24_69] : memref<8x32xf32, #tpu.memory_space<vmem>>, vector<8x8xf32>
    tpu.vector_store %arg9[%c0_68, %c24_69], %98 {strides = array<i32>} : memref<8x32xf32, #tpu.memory_space<vmem>>, vector<8x8xf32>,
    %c0_70 = arith.constant 0 : index
    %c0_71 = arith.constant 0 : index
    %100 = vector.load %arg9[%c0_70, %c0_71] : memref<8x32xf32, #tpu.memory_space<vmem>>, vector<8x32xf32>
    %cst_72 = arith.constant dense<0.000000e+00> : vector<8x32xf32>
    %101 = tpu.matmul %100, %7, %cst_72 {dimension_numbers = #tpu.dot_dimension_numbers<[1], [0], [0], [1], [0, 0, 1, 1], [], []>} : vector<8x32xf32>, vector<32x32xf32>, vector<8x32xf32> -> vector<8x32xf32>
    %102 = vector.shape_cast %101 : vector<8x32xf32> to vector<1x8x32xf32>
    %c0_73 = arith.constant 0 : index
    %c0_74 = arith.constant 0 : index
    %c0_75 = arith.constant 0 : index
    %103 = vector.load %arg5[%c0_73, %c0_74, %c0_75] : memref<1x8x32xf32, #tpu.memory_space<vmem>>, vector<1x8x32xf32>
    tpu.vector_store %arg5[%c0_73, %c0_74, %c0_75], %102 {strides = array<i32>} : memref<1x8x32xf32, #tpu.memory_space<vmem>>, vector<1x8x32xf32>,
    return
  }
  func.func @transform_0(%arg0: i32) -> (i32, i32, i32) {
    %c0_i32 = arith.constant 0 : i32
    %c0_i32_0 = arith.constant 0 : i32
    %c0_i32_1 = arith.constant 0 : i32
    return %arg0, %c0_i32, %c0_i32_0 : i32, i32, i32
  }
  func.func @transform_1(%arg0: i32) -> (i32, i32, i32) {
    %c0_i32 = arith.constant 0 : i32
    %c0_i32_0 = arith.constant 0 : i32
    %c0_i32_1 = arith.constant 0 : i32
    return %arg0, %c0_i32, %c0_i32_0 : i32, i32, i32
  }
  func.func @transform_2(%arg0: i32) -> (i32, i32, i32) {
    %c0_i32 = arith.constant 0 : i32
    %c0_i32_0 = arith.constant 0 : i32
    %c0_i32_1 = arith.constant 0 : i32
    return %arg0, %c0_i32, %c0_i32_0 : i32, i32, i32
  }
  func.func @transform_3(%arg0: i32) -> (i32, i32, i32) {
    %c0_i32 = arith.constant 0 : i32
    %c0_i32_0 = arith.constant 0 : i32
    %c0_i32_1 = arith.constant 0 : i32
    %c0_i32_2 = arith.constant 0 : i32
    return %c0_i32, %c0_i32_0, %c0_i32_1 : i32, i32, i32
  }
  func.func @transform_4(%arg0: i32) -> (i32, i32, i32) {
    %c0_i32 = arith.constant 0 : i32
    %c0_i32_0 = arith.constant 0 : i32
    %c0_i32_1 = arith.constant 0 : i32
    return %arg0, %c0_i32, %c0_i32_0 : i32, i32, i32
  }
}

</mosaic_0001>

<bundles_post_ra>
// kernel: tpu_custom_call.1
= control target key start
LH: loop header
LB: loop body
LE: loop exit
PB: predicated region body
PF: predicated region fallthrough
CT: control target
= control target key end

     0   :  { %s2273_s0 = inlined_call_operand.hbm [shape: f32[2,8,32], index: 0, kind: input, shape index: {}]   ;;  %s2274_s1 = inlined_call_operand.hbm [shape: f32[2,8,32], index: 1, kind: input, shape index: {}]   ;;  %s2275_s2 = inlined_call_operand.hbm [shape: f32[2,8,32], index: 2, kind: input, shape index: {}]   ;;  %s2276_s3 = inlined_call_operand.hbm [shape: f32[4,32,32], index: 3, kind: input, shape index: {}]   ;;  %s2277_s4 = inlined_call_operand.hbm [shape: f32[2,8,32], index: 4, kind: output, shape index: {}]  }
   0x1   :  { %2289 = sst [smem:[#allocation24_spill]] %s2274_s1 }
   0x2   :  { %9 = vsyncpa [#allocation7], 0 }
   0x3   :  { %11 = vsyncpa [#allocation7 + $0x1], 0 }
   0x4   :  { %12 = vsyncpa [#allocation10], 0 }
   0x5   :  { %14 = vsyncpa [#allocation10 + $0x1], 0 }
   0x6   :  { %15 = vsyncpa [#allocation13], 0 }
   0x7   :  { %16 = vsyncpa [#allocation8], 0 }
   0x8   :  { %18 = vsyncpa [#allocation8 + $0x1], 0  ;;  %s1925_s15 = smov 0   ;;  %s1927_s16 = smov 0  }
   0x9   :  { %s1929_s17 = smov 0   ;;  %s1931_s18 = smov 0  }
   0xa LB: > { %2290 = sst [smem:[#allocation19_spill]] %s1871_s15  ;;  %s1946_s19 = sadd.s32 1, %s1883_s18   ;;  %s1883_s18 = sphi %s1931_s18, %s2315_s18   ;;  %s1879_s17 = sphi %s1929_s17, %s2319_s17   ;;  %s1875_s16 = sphi %s1927_s16, %s2318_s16   ;;  %s1871_s15 = sphi %s1925_s15, %s2317_s15  }
   0xb   : > { %2291 = sst [smem:[#allocation20_spill]] %s1883_s18  ;;  %s31_s20 = sadd.s32 1, %s1879_s17 }
   0xc   : > { %2292 = sst [smem:[#allocation21_spill]] %s1946_s19  ;;  %s28_s21 = ssub.s32 %s1883_s18, %s1946_s19 }
   0xd   : > { %p2278_p0 = scmp.ne.s32.totalorder %s1879_s17, %s1875_s16  ;;  %p29_p1 = scmp.eq.s32.totalorder %s28_s21, 0 }
   0xe   : > { %p39_p2 = scmp.eq.s32.totalorder %s1883_s18, 0  ;;  %p1639_p4 = scmp.lt.s32.totalorder %s1883_s18, 2 }
   0xf   : > { %s1957_s22 = scalar_select %p29_p1, %s1879_s17, %s31_s20  }
  0x10   : > { %p40_p5 = por %p39_p2, %p2278_p0  ;;  %s2279_s23 = sand.u32 1, %s1879_s17  }
  0x11   : > { %2293 = sst [smem:[#allocation22_spill]] %s1957_s22  ;;  %s1965_s24 = sshll.u32 %s2279_s23, 3 }
  0x12   : > { %s1968_s25 = sshll.u32 %s1883_s18, 7  ;;  %p1970_p6 = pnand %p1639_p4, %p40_p5 }
  0x13   : > { %s198_s27 = sand.u32 1, %s1883_s18   ;;  %s2295_s1 = sld [smem:[#allocation24_spill]] }
  0x14   : > { %s202_s5 = scalar_lea.vmem [#allocation9], %s1965_s24  ;;  %s1982_s7 = scalar_lea.sflag [#allocation10], %s198_s27 }
  0x15   : > { %s209_s6 = sshll.u32 %s202_s5, 4  ;;  %p1988_p8 = pneg %p1970_p6  ;;  %s210_s6 = int_to_ptr.vmem [resolvable:$true] %s209_s6 }
  0x19   : > { %s1979_s30 = scalar_lea.hbm %s2295_s1, %s1968_s25  ;;  %s1706_s12 = scalar_lea.hbm %s2295_s1, 256 }
  0x1a   : > { %s1701_s8 = scalar_lea.hbm %s1979_s30, 128  ;;  %p1707_p11 = scmp.lt.s32.totalorder %s1979_s30, %s2295_s1 }
  0x1b   : > { %p1702_p7 = scmp.ne.s32.totalorder %s1979_s30, %s1701_s8  ;;  %p1708_p12 = scmp.lt.s32.totalorder %s1706_s12, %s1701_s8 }
  0x1d   : > { %p1704_p9 = pnand %p1988_p8, %p1702_p7  ;;  %p1709_p13 = por %p1708_p12, %p1707_p11 }
  0x1f   : > { %p1705_p10 = pneg %p1704_p9 }
  0x21   : > { %p1710_p1 = pnand %p1709_p13, %p1705_p10 }
  0x23   : > { %1713 = shalt.err (!%p1710_p1)
}
  0x24   : > { %s1714_s20 = scalar_lea.vmem %s210_s6, 128  ;;  %s1885_s21 = smov [#allocation9]  }
  0x25   : > { %p1715_p2 = scmp.ne.s32.totalorder %s210_s6, %s1714_s20  ;;  %s1719_s27 = sshll.u32 %s1885_s21, 4  ;;  %s1720_s27 = int_to_ptr.vmem [resolvable:$false] %s1719_s27 }
  0x26   : > { %s1721_s28 = scalar_lea.vmem %s1720_s27, 256  ;;  %p1722_p7 = scmp.lt.s32.totalorder %s210_s6, %s1720_s27 }
  0x27   : > { %p1717_p4 = pnand %p1715_p2, %p1988_p8  ;;  %p1723_p9 = scmp.lt.s32.totalorder %s1721_s28, %s1714_s20 }
  0x29   : > { %p1718_p5 = pneg %p1717_p4  ;;  %p1724_p3 = por %p1723_p9, %p1722_p7 }
  0x2b   : > { %p1725_p0 = pnand %p1724_p3, %p1718_p5 }
  0x2d   : > { %1728 = shalt.err (!%p1725_p0)
}
  0x2e   : > { %1630 = dma.hbm_to_vmem [thread:$0]  (!%p1970_p6), %s1979_s30, 128, %s210_s6, %s1982_s7  }
  0x2f   : > { %s2008_s29 = sadd.s32 4294967295, %s1883_s18   ;;  %s1452_s5 = sadd.s32 4294967294, %s1883_s18  }
  0x30   : > { %p44_p0 = scmp.ne.s32.totalorder %s1875_s16, %s1871_s15  ;;  %p2280_p3 = scmp.eq.s32.totalorder %s2008_s29, 0 }
  0x31   : > { %p141_p10 = scmp.eq.s32.totalorder %s2008_s29, 1  ;;  %p147_p11 = scmp.eq.s32.totalorder %s1452_s5, 1 }
  0x32   : > { %p2017_p12 = por %p2280_p3, %p44_p0  ;;  %p1453_p13 = scmp.ge.s32.totalorder %s1883_s18, 1 }
  0x33   : > { %p2298_p1 = scmp.ne.s32.totalorder %s1879_s17, %s1875_s16  ;;  %p2029_p4 = por %p147_p11, %p44_p0 }
  0x34   : > { %s2297_s8 = scalar_select %p2017_p12, 1, 0 }
  0x35   : > { %p2025_p2 = por %p141_p10, %p2298_p1  ;;  %p154_p5 = scmp.lt.s32.totalorder %s1883_s18, 3 }
  0x36   : > { %s2300_s6 = scalar_select %p2029_p4, 1, 0 }
  0x37   : > { %s2299_s30 = scalar_select %p2025_p2, 1, 0 }
  0x38   : > { %2301 = sst [smem:[#allocation23_spill]] %s2300_s6  ;;  %p2034_p7 = pnand %p1453_p13, %p154_p5 }
  0x39   : > { %s1886_s11 = smov [#allocation12]   ;;  %s2044_s20 = scalar_lea.hbm %s2273_s0, %s1968_s25 }
  0x3a   : > { %s2302_s10 = scalar_select %p2034_p7, 1, 0 }
  0x3b   : > { %s166_s12 = sshll.u32 %s1886_s11, 4  ;;  %p1620_p9 = pneg %p2034_p7  ;;  %s167_s12 = int_to_ptr.vmem [resolvable:$true] %s166_s12 }
  0x3c   : > { %s184_s27 = scalar_lea.vmem [#allocation6], %s1965_s24  ;;  %s2059_s23 = scalar_lea.hbm %s2275_s2, %s1968_s25 }
  0x3d   : > { %p2048_p0 = pnand %p1620_p9, %p2280_p3  ;;  %s191_s28 = sshll.u32 %s184_s27, 4  ;;  %s2053_s28 = int_to_ptr.vmem [resolvable:$true] %s191_s28 }
  0x3e   : > { %s1740_s13 = scalar_lea.vmem %s167_s12, 2048  ;;  %p1748_p5 = scmp.lt.s32.totalorder %s167_s12, %s167_s12 }
  0x3f   : > { %p1731_p10 = pneg %p2048_p0  ;;  %p1741_p11 = scmp.ne.s32.totalorder %s167_s12, %s1740_s13 }
  0x40   : > { %p1749_p9 = scmp.lt.s32.totalorder %s1740_s13, %s1740_s13 }
  0x41   : > { %p1743_p13 = pnand %p1741_p11, %p1731_p10 }
  0x42   : > { %p1750_p3 = por %p1749_p9, %p1748_p5 }
  0x43   : > { %p1744_p1 = pneg %p1743_p13 }
  0x45   : > { %p1751_p4 = pnand %p1750_p3, %p1744_p1 }
  0x47   : > { %1754 = shalt.err (!%p1751_p4)
}
  0x48   : > { %s1887_s14 = smov 128   ;;  %s1888_s25 = smov 8  }
  0x49   : > { %1623 = dma.hbm_to_vmem [thread:$0]  (!%p2048_p0), %s2276_s3, 2048, %s167_s12, [#allocation13], %s1887_s14, %s1887_s14, %s1888_s25  }
  0x4a   : > { %s2304_s11 = sand.u32 1, %s1879_s17   ;;  %s1755_s22 = scalar_lea.hbm %s2044_s20, 128 }
  0x4b   : > { %s181_s1 = scalar_lea.sflag [#allocation7], %s2304_s11  ;;  %p1756_p10 = scmp.ne.s32.totalorder %s2044_s20, %s1755_s22 }
  0x4c   : > { %s1760_s18 = scalar_lea.hbm %s2273_s0, 256  ;;  %p1761_p11 = scmp.lt.s32.totalorder %s2044_s20, %s2273_s0 }
  0x4d   : > { %p1758_p3 = pnand %p1756_p10, %p1988_p8  ;;  %p1762_p13 = scmp.lt.s32.totalorder %s1760_s18, %s1755_s22 }
  0x4f   : > { %p1759_p4 = pneg %p1758_p3  ;;  %p1763_p1 = por %p1762_p13, %p1761_p11 }
  0x51   : > { %p1764_p5 = pnand %p1763_p1, %p1759_p4 }
  0x53   : > { %1767 = shalt.err (!%p1764_p5)
}
  0x54   : > { %s1768_s12 = scalar_lea.vmem %s2053_s28, 128  ;;  %s1889_s21 = smov [#allocation6]  }
  0x55   : > { %p1769_p0 = scmp.ne.s32.totalorder %s2053_s28, %s1768_s12  ;;  %s1773_s19 = sshll.u32 %s1889_s21, 4  ;;  %s1774_s19 = int_to_ptr.vmem [resolvable:$false] %s1773_s19 }
  0x56   : > { %s1775_s14 = scalar_lea.vmem %s1774_s19, 256  ;;  %p1776_p3 = scmp.lt.s32.totalorder %s2053_s28, %s1774_s19 }
  0x57   : > { %p1771_p9 = pnand %p1769_p0, %p1988_p8  ;;  %p1777_p2 = scmp.lt.s32.totalorder %s1775_s14, %s1768_s12 }
  0x59   : > { %p1772_p10 = pneg %p1771_p9  ;;  %p1778_p12 = por %p1777_p2, %p1776_p3 }
  0x5b   : > { %p1779_p7 = pnand %p1778_p12, %p1772_p10 }
  0x5d   : > { %1782 = shalt.err (!%p1779_p7)
}
  0x5e   : > { %1627 = dma.hbm_to_vmem [thread:$0]  (!%p1970_p6), %s2044_s20, 128, %s2053_s28, %s181_s1  }
  0x5f   : > { %s220_s15 = scalar_lea.vmem [#allocation11], %s1965_s24  ;;  %s1783_s22 = scalar_lea.hbm %s2059_s23, 128 }
  0x60   : > { %s227_s18 = sshll.u32 %s220_s15, 4  ;;  %p1784_p4 = scmp.ne.s32.totalorder %s2059_s23, %s1783_s22  ;;  %s228_s18 = int_to_ptr.vmem [resolvable:$true] %s227_s18 }
  0x61   : > { %s1788_s27 = scalar_lea.hbm %s2275_s2, 256  ;;  %p1789_p12 = scmp.lt.s32.totalorder %s2059_s23, %s2275_s2 }
  0x62   : > { %p1786_p11 = pnand %p1784_p4, %p1988_p8  ;;  %p1790_p7 = scmp.lt.s32.totalorder %s1788_s27, %s1783_s22 }
  0x64   : > { %p1787_p2 = pneg %p1786_p11  ;;  %p1791_p13 = por %p1790_p7, %p1789_p12 }
  0x66   : > { %p1792_p1 = pnand %p1791_p13, %p1787_p2 }
  0x68   : > { %1795 = shalt.err (!%p1792_p1)
}
  0x69   : > { %s1796_s1 = scalar_lea.vmem %s228_s18, 128  ;;  %s1890_s24 = smov [#allocation11]  }
  0x6a   : > { %p1797_p5 = scmp.ne.s32.totalorder %s228_s18, %s1796_s1  ;;  %s1801_s20 = sshll.u32 %s1890_s24, 4  ;;  %s1802_s20 = int_to_ptr.vmem [resolvable:$false] %s1801_s20 }
  0x6b   : > { %s1803_s28 = scalar_lea.vmem %s1802_s20, 256  ;;  %p1804_p10 = scmp.lt.s32.totalorder %s228_s18, %s1802_s20 }
  0x6c   : > { %p1799_p0 = pnand %p1797_p5, %p1988_p8  ;;  %p1805_p3 = scmp.lt.s32.totalorder %s1803_s28, %s1796_s1 }
  0x6e   : > { %p1800_p9 = pneg %p1799_p0  ;;  %p1806_p4 = por %p1805_p3, %p1804_p10 }
  0x70   : > { %p1807_p11 = pnand %p1806_p4, %p1800_p9 }
  0x72   : > { %1810 = shalt.err (!%p1807_p11)
}
  0x73   : > { %1633 = dma.hbm_to_vmem [thread:$0]  (!%p1970_p6), %s2059_s23, 128, %s228_s18, %s1982_s7  }
  0x74   : > { %p2305_p2 = scmp.ne.s32.totalorder %s2302_s10, 0 }
  0x75   : > { %s2111_s9 = sand.u32 (!%p2305_p2), 1, %s1875_s16   ;;  %p2306_p8 = scmp.ne.s32.totalorder (!%p2305_p2), %s2297_s8, 0 }
  0x76   : > { %236 = sbr.rel (%p2305_p2) target bundleno = 1581 (0x62d), region = 36  ;;  %s2114_s13 = sshll.u32 (!%p2305_p2), %s2111_s9, 3 }
  0x77   : > { %s239_s12 = scalar_lea.sflag (!%p2305_p2), [#allocation7], %s2111_s9  ;;  %s242_s21 = scalar_lea.vmem (!%p2305_p2), [#allocation6], %s2114_s13 }
  0x7b   : > { %1854 = dma.done.wait (%p2306_p8), %s239_s12, 128  }
  0x7c   : > { %1856 = vsyncadd (%p2306_p8), %s239_s12, 4294967168  ;;  %s247_s23 = sand.u32 1, %s2008_s29   ;;  %s251_s7 = scalar_lea.vmem [#allocation9], %s2114_s13 }
  0x7d   : > { %s248_s26 = scalar_lea.sflag [#allocation10], %s247_s23 }
  0x7e   : > { %1858 = dma.done.wait (%p2306_p8), %s248_s26, 256  }
  0x7f   : > { %1860 = vsyncadd (%p2306_p8), %s248_s26, 4294967040  ;;  %s260_s10 = scalar_lea.vmem [#allocation11], %s2114_s13  ;;  %p2307_p6 = scmp.eq.s32.totalorder %s2008_s29, 0 }
  0x81   : > { %1862 = dma.done.wait (%p2307_p6), [#allocation13], 2048   ;;  %p2308_p12 = pmov %p2307_p6 }
  0x82   : > { %v1891_v0 = vmov 0.0   ;;  %vm1892_vm0 = vmmov 0   ;;  %v302_v1 = vld [vmem:[#allocation12 + $0x18] sm:$0xff]  ;;  %v301_v3 = vld [vmem:[#allocation12 + $0x10] sm:$0xff]  ;;  %v300_v5 = vld [vmem:[#allocation12 + $0x8] sm:$0xff]  ;;  %vm321_vm1 = vcmask 261120  }
  0x83   : > { %1864 = vsyncadd (%p2308_p12), [#allocation13], 4294965248  ;;  %1524 = vmatprep.subr.mxu0 %v1891_v0  ;;  %1535 = vmatprep.subr.mxu1 %v1891_v0  ;;  %v307_v2 = vld [vmem:[#allocation12 + $0x38] sm:$0xff]  ;;  %v306_v4 = vld [vmem:[#allocation12 + $0x30] sm:$0xff]  ;;  %vm547_vm2 = vcmask 64512   ;;  %s1893_s8 = smov 120  }
  0x84   : > { %1532 = vmatprep.mubr.msk.f32.mxu0 %vm1892_vm0, %v1891_v0  ;;  %1543 = vmatprep.mubr.msk.f32.mxu1 %vm1892_vm0, %v1891_v0  ;;  %v305_v6 = vld [vmem:[#allocation12 + $0x28] sm:$0xff]  ;;  %v299_v7 = vld [vmem:[#allocation12] sm:$0xff]  ;;  %v318_v9 = vld [vmem:[%s242_s21] sm:$0xff]  ;;  %s1894_s19 = smov 112   ;;  %s1895_s14 = smov 104   ;;  %vm884_vm3 = vcmask 130112  }
  0x85   : > { %1525 = vmatpush3.msra.mxu0 %v302_v1  ;;  %1536 = vmatpush3.msra.mxu1 %v307_v2  ;;  %v304_v8 = vld [vmem:[#allocation12 + $0x20] sm:$0xff]  ;;  %v312_v11 = vld [vmem:[#allocation12 + $0x58] sm:$0xff]  ;;  %v311_v12 = vld [vmem:[#allocation12 + $0x50] sm:$0xff]  ;;  %s1896_s15 = smov 8   ;;  %s1897_s18 = smov 16   ;;  %vm1061_vm4 = vcmask 195712  }
  0x86   : > { %1526 = vmatprep.subr.mxu0 %v1891_v0  ;;  %1537 = vmatprep.subr.mxu1 %v1891_v0  ;;  %v319_v10 = vld [vmem:[%s251_s7] sm:$0xff]  ;;  %v320_v15 = vld [vmem:[%s260_s10] sm:$0xff]  ;;  %s1898_s22 = smov 24   ;;  %vm1238_vm5 = vcmask 261312   ;;  %s1485_s6 = sshll.u32 %s2008_s29, 7 }
  0x87   : > { %1527 = vmatpush3.msra.mxu0 %v301_v3  ;;  %1538 = vmatpush3.msra.mxu1 %v306_v4  ;;  %v310_v13 = vld [vmem:[#allocation12 + $0x48] sm:$0xff]  ;;  %v309_v14 = vld [vmem:[#allocation12 + $0x40] sm:$0xff]  ;;  %s298_s25 = scalar_lea.vmem [#allocation14], %s2114_s13  ;;  %s2229_s1 = scalar_lea.hbm %s2277_s4, %s1485_s6 }
  0x88   : > { %1528 = vmatprep.subr.mxu0 %v1891_v0  ;;  %1539 = vmatprep.subr.mxu1 %v1891_v0  ;;  %s1329_s27 = sshll.u32 %s298_s25, 4  ;;  %s1316_s24 = scalar_lea.sflag [#allocation8], %s2111_s9  ;;  %s2231_s27 = int_to_ptr.vmem [resolvable:$true] %s1329_s27 }
  0x89   : > { %1529 = vmatpush3.msra.mxu0 %v300_v5  ;;  %1540 = vmatpush3.msra.mxu1 %v305_v6  ;;  %s1811_s20 = scalar_lea.vmem %s2231_s27, 128  ;;  %p2309_p13 = scmp.ne.s32.totalorder %s2299_s30, 0 }
  0x8a   : > { %1530 = vmatprep.subr.mxu0 %v1891_v0  ;;  %1541 = vmatprep.subr.mxu1 %v1891_v0  ;;  %p1812_p7 = scmp.ne.s32.totalorder %s2231_s27, %s1811_s20  ;;  %s1899_s29 = smov [#allocation14]  }
  0x8b   : > { %1531 = vmatpush3.msra.mxu0 %v299_v7  ;;  %1542 = vmatpush3.msra.mxu1 %v304_v8  ;;  %s1815_s28 = sshll.u32 %s1899_s29, 4  ;;  %s1816_s28 = int_to_ptr.vmem [resolvable:$false] %s1815_s28 }
  0x8c   : > { %1533 = vmatmul.mubr.msk.f32.vlgmr.msra.gmra.mxu0 %vm321_vm1, %v318_v9  ;;  %1544 = vmatmul.mubr.msk.f32.vlgmr.msra.gmra.mxu1 %vm321_vm1, %v319_v10  ;;  %p1813_p1 = pnand %p1812_p7, %p2309_p13  ;;  %s1817_s13 = scalar_lea.vmem %s1816_s28, 256 }
  0x8d   : > { %1557 = vmatprep.subr.mxu1 %v1891_v0  ;;  %1559 = vmatprep.mubr.msk.f32.mxu1 %vm1892_vm0, %v1891_v0  ;;  %p1818_p0 = scmp.lt.s32.totalorder %s2231_s27, %s1816_s28  ;;  %p1819_p9 = scmp.lt.s32.totalorder %s1817_s13, %s1811_s20 }
  0x8e   : > { %1546 = vmatprep.subr.mxu0 %v1891_v0  ;;  %1554 = vmatprep.mubr.msk.f32.mxu0 %vm1892_vm0, %v1891_v0  ;;  %p1814_p5 = pneg %p1813_p1 }
  0x8f   : > { %1547 = vmatpush3.msra.mxu0 %v312_v11  ;;  %v317_v11 = vld [vmem:[#allocation12 + $0x78] sm:$0xff]  ;;  %p1820_p10 = por %p1819_p9, %p1818_p0 }
  0x90   : > { %1548 = vmatprep.subr.mxu0 %v1891_v0 }
  0x91   : > { %1549 = vmatpush3.msra.mxu0 %v311_v12  ;;  %v316_v12 = vld [vmem:[#allocation12 + $0x70] sm:$0xff]  ;;  %p1821_p3 = pnand %p1820_p10, %p1814_p5 }
  0x92   : > { %1550 = vmatprep.subr.mxu0 %v1891_v0 }
  0x93   : > { %1551 = vmatpush3.msra.mxu0 %v310_v13 }
  0x94   : > { %1552 = vmatprep.subr.mxu0 %v1891_v0 }
  0x95   : > { %1553 = vmatpush3.msra.mxu0 %v309_v14 }
  0x96   : > { %1577 = vmatprep.subr.mxu0 %v1891_v0  ;;  %1555 = vmatmul.mubr.msk.f32.vlgmr.msra.gmra.mxu0 %vm321_vm1, %v320_v15  ;;  %v315_v15 = vld [vmem:[#allocation12 + $0x68] sm:$0xff] }
  0x97   : > { %1579 = vmatprep.mubr.msk.f32.mxu0 %vm1892_vm0, %v1891_v0 }
 0x14c   : > { %v391_v16 = vpop.f32.mrf.mxu0  ;;  %v465_v17 = vpop.f32.mrf.mxu1 }
 0x14d   : > { %395 = vst.msk [vmem:[#allocation2] sm:$0xff] %vm321_vm1, %v391_v16  ;;  %469 = vst.msk [vmem:[#allocation3] sm:$0xff] %vm321_vm1, %v465_v17 }
 0x14e   : > { %v1545_v18 = vpop.f32.mrf.mxu1  ;;  %v1534_v19 = vpop.f32.mrf.mxu0 }
 0x14f   : > { %v314_v18 = vld [vmem:[#allocation12 + $0x60] sm:$0xff] }
 0x154   : > { %v545_v20 = vld [vmem:[#allocation3] sm:$0xff]  ;;  %v709_v21 = vld [vmem:[#allocation2] sm:$0xff] }
 0x155   : > { %1558 = vmatpush3.xpose.msk.msra.mxu1 %vm547_vm2, %v545_v20  ;;  %713 = vrot.lane.b32.xlu1 %v709_v21, %s1893_s8 }
 0x156   : > { %1562 = vmatprep.subr.mxu1 %v1891_v0  ;;  %v539_v27 = vpop.f32.mrf.mxu0 }
 0x157   : > { %543 = vst.msk [vmem:[#allocation4] sm:$0xff] %vm321_vm1, %v539_v27 }
 0x158   : > { %1560 = vmatmul.mubr.msk.f32.vlgmr.msra.gmra.mxu1 %vm547_vm2, %v709_v21  ;;  %v1556_v28 = vpop.f32.mrf.mxu0 }
 0x159   : > { %893 = vrot.lane.b32.xlu1 %v545_v20, %s1894_s19  ;;  %1564 = vmatprep.mubr.msk.f32.mxu1 %vm1892_vm0, %v1891_v0 }
 0x15d   : > { %890 = vrot.lane.b32.xlu1 %v709_v21, %s1894_s19 }
 0x15e   : > { %v546_v32 = vld [vmem:[#allocation4] sm:$0xff] }
 0x15f   : > { %1563 = vmatpush3.msra.mxu1 %v546_v32 }
 0x160   : > { %1567 = vmatprep.subr.mxu1 %v1891_v0 }
 0x161   : > { %1070 = vrot.lane.b32.xlu1 %v545_v20, %s1895_s14 }
 0x165   : > { %1067 = vrot.lane.b32.xlu1 %v709_v21, %s1895_s14 }
 0x1c7   : > { %v714_v22 = vpop.permute.xlu1 %713 }
 0x1cb   : > { %v894_v23 = vpop.permute.xlu1 %893 }
 0x1cc   : > { %1578 = vmatpush3.xpose.msk.msra.mxu0 %vm547_vm2, %v894_v23 }
 0x1cd   : > { %1587 = vmatprep.subr.mxu0 %v1891_v0 }
 0x1cf   : > { %v891_v24 = vpop.permute.xlu1 %890 }
 0x1d0   : > { %1580 = vmatmul.mubr.msk.f32.vlgmr.msra.gmra.mxu0 %vm547_vm2, %v891_v24 }
 0x1d1   : > { %1589 = vmatprep.mubr.msk.f32.mxu0 %vm1892_vm0, %v1891_v0 }
 0x1d3   : > { %v1071_v25 = vpop.permute.xlu1 %1070 }
 0x1d4   : > { %1588 = vmatpush3.xpose.msk.msra.mxu0 %vm547_vm2, %v1071_v25 }
 0x1d5   : > { %1597 = vmatprep.subr.mxu0 %v1891_v0 }
 0x1d7   : > { %v1068_v26 = vpop.permute.xlu1 %1067 }
 0x1d8   : > { %1590 = vmatmul.mubr.msk.f32.vlgmr.msra.gmra.mxu0 %vm547_vm2, %v1068_v26 }
 0x1d9   : > { %1605 = vmatprep.mubr.msk.f32.mxu0 %vm1892_vm0, %v1891_v0  ;;  %1598 = vmatpush3.msra.mxu0 %v317_v11 }
 0x1da   : > { %1599 = vmatprep.subr.mxu0 %v1891_v0 }
 0x1db   : > { %1600 = vmatpush3.msra.mxu0 %v316_v12 }
 0x1dc   : > { %1601 = vmatprep.subr.mxu0 %v1891_v0 }
 0x1dd   : > { %1602 = vmatpush3.msra.mxu0 %v315_v15 }
 0x1de   : > { %1603 = vmatprep.subr.mxu0 %v1891_v0 }
 0x1df   : > { %1604 = vmatpush3.msra.mxu0 %v314_v18 }
 0x218   : > { %v620_v29 = vpop.f32.mrf.mxu1 }
 0x219   : > { %v624_v30 = vsel %vm547_vm2, %v620_v29, -inf }
 0x21a   : > { %625 = vmax.xlane.f32.xlu0 %v624_v30  ;;  %v1561_v31 = vpop.f32.mrf.mxu1 }
 0x230   : > { %716 = vrot.lane.b32.xlu0 %v545_v20, %s1893_s8 }
 0x290   : > { %v965_v33 = vpop.f32.mrf.mxu0 }
 0x291   : > { %v969_v34 = vsel %vm547_vm2, %v965_v33, -inf }
 0x292   : > { %970 = vmax.xlane.f32.xlu0 %v969_v34  ;;  %v1581_v35 = vpop.f32.mrf.mxu0 }
 0x298   : > { %v1142_v36 = vpop.f32.mrf.mxu0 }
 0x299   : > { %v1146_v37 = vsel %vm547_vm2, %v1142_v36, -inf }
 0x29a   : > { %1147 = vmax.xlane.f32.xlu1 %v1146_v37  ;;  %v1591_v38 = vpop.f32.mrf.mxu0 }
 0x2a3   : > { %v626_v39 = vpop.xlane.xlu0 %625 }
 0x2a4   : > { %v627_v40 = vsub.f32 %v620_v29, %v626_v39 }
 0x2a6   : > { %v628_v41 = vmul.f32 1.442695, %v627_v40 }
 0x2a7   : > { %v717_v43 = vpop.permute.xlu0 %716 }
 0x2a8   : > { %1685 = vpow2.f32 %v628_v41  ;;  %802 = vrot.lane.b32.xlu0 %v546_v32, %s1893_s8 }
 0x2b5   : > { %v1686_v42 = vpop.eup %1685 }
 0x2b6   : > { %1565 = vmatmul.mubr.msk.f32.vlgmr.msra.gmra.mxu1 %vm547_vm2, %v1686_v42  ;;  %v630_v4 = vsel %vm547_vm2, %v1686_v42, 0.0 }
 0x2b7   : > { %1568 = vmatpush3.xpose.msk.msra.mxu1 %vm547_vm2, %v717_v43  ;;  %1569 = vmatprep.mubr.msk.f32.mxu1 %vm1892_vm0, %v1891_v0 }
 0x2b8   : > { %1572 = vmatprep.subr.mxu1 %v1891_v0 }
 0x2ba   : > { %1570 = vmatmul.mubr.msk.f32.vlgmr.msra.gmra.mxu1 %vm547_vm2, %v714_v22 }
 0x2bb   : > { %1574 = vmatprep.mubr.msk.f32.mxu1 %vm1892_vm0, %v1891_v0 }
 0x31b   : > { %v971_v44 = vpop.xlane.xlu0 %970 }
 0x31c   : > { %v972_v51 = vsub.f32 %v965_v33, %v971_v44 }
 0x31e   : > { %v973_v52 = vmul.f32 1.442695, %v972_v51 }
 0x31f   : > { %v803_v45 = vpop.permute.xlu0 %802 }
 0x320   : > { %1573 = vmatpush3.msra.mxu1 %v803_v45  ;;  %1687 = vpow2.f32 %v973_v52 }
 0x321   : > { %1582 = vmatprep.subr.mxu1 %v1891_v0 }
 0x323   : > { %v1148_v55 = vpop.xlane.xlu1 %1147 }
 0x324   : > { %v1149_v56 = vsub.f32 %v1142_v36, %v1148_v55 }
 0x326   : > { %v1150_v59 = vmul.f32 1.442695, %v1149_v56 }
 0x32d   : > { %v1688_v53 = vpop.eup %1687 }
 0x32e   : > { %v975_v54 = vsel %vm547_vm2, %v1688_v53, 0.0 }
 0x376   : > { %v702_v46 = vpop.f32.mrf.mxu1 }
 0x378   : > { %v1566_v47 = vpop.f32.mrf.mxu1 }
 0x37a   : > { %v788_v48 = vpop.f32.mrf.mxu1 }
 0x37b   : > { %v792_v49 = vsel %vm547_vm2, %v788_v48, -inf }
 0x37c   : > { %v1571_v50 = vpop.f32.mrf.mxu1  ;;  %793 = vmax.xlane.f32.xlu1 %v792_v49 }
 0x38d   : > { %979 = vrot.lane.b32.xlu1 %v546_v32, %s1894_s19 }
 0x391   : > { %1156 = vrot.lane.b32.xlu1 %v546_v32, %s1895_s14 }
 0x3b5   : > { %976 = vadd.xlane.f32.xlu1 %v975_v54 }
 0x405   : > { %v794_v57 = vpop.xlane.xlu1 %793 }
 0x406   : > { %v795_v58 = vsub.f32 %v788_v48, %v794_v57 }
 0x408   : > { %v796_v60 = vmul.f32 1.442695, %v795_v58 }
 0x409   : > { %v980_v61 = vpop.permute.xlu1 %979 }
 0x40a   : > { %1689 = vpow2.f32 %v796_v60 }
 0x40b   : > { %1691 = vpow2.f32 %v1150_v59 }
 0x40d   : > { %v1157_v2 = vpop.permute.xlu1 %1156 }
 0x417   : > { %v1690_v62 = vpop.eup %1689 }
 0x418   : > { %1575 = vmatmul.mubr.msk.f32.vlgmr.msra.gmra.mxu1 %vm547_vm2, %v1690_v62  ;;  %v798_v63 = vsel %vm547_vm2, %v1690_v62, 0.0  ;;  %v1692_v1 = vpop.eup %1691 }
 0x419   : > { %1583 = vmatpush3.msra.mxu1 %v980_v61  ;;  %799 = vadd.xlane.f32.xlu0 %v798_v63  ;;  %v1152_v3 = vsel %vm547_vm2, %v1692_v1, 0.0 }
 0x41a   : > { %1584 = vmatprep.mubr.msk.f32.mxu1 %vm1892_vm0, %v1891_v0  ;;  %1592 = vmatprep.subr.mxu1 %v1891_v0 }
 0x41c   : > { %1585 = vmatmul.mubr.msk.f32.vlgmr.msra.gmra.mxu1 %vm547_vm2, %v1688_v53 }
 0x41d   : > { %1593 = vmatpush3.msra.mxu1 %v1157_v2  ;;  %1153 = vadd.xlane.f32.xlu0 %v1152_v3 }
 0x41e   : > { %1594 = vmatprep.mubr.msk.f32.mxu1 %vm1892_vm0, %v1891_v0 }
 0x420   : > { %1595 = vmatmul.mubr.msk.f32.vlgmr.msra.gmra.mxu1 %vm547_vm2, %v1692_v1 }
 0x421   : > { %631 = vadd.xlane.f32.xlu0 %v630_v4 }
 0x43e   : > { %v977_v10 = vpop.xlane.xlu1 %976 }
 0x4a2   : > { %v800_v5 = vpop.xlane.xlu0 %799 }
 0x4a6   : > { %v1154_v6 = vpop.xlane.xlu0 %1153 }
 0x4aa   : > { %v632_v7 = vpop.xlane.xlu0 %631 }
 0x4ab   : > { %1693 = vrcp.f32 %v632_v7 }
 0x4ac   : > { %1695 = vrcp.f32 %v800_v5 }
 0x4ad   : > { %1697 = vrcp.f32 %v977_v10 }
 0x4ae   : > { %1699 = vrcp.f32 %v1154_v6 }
 0x4b8   : > { %v1694_v8 = vpop.eup %1693 }
 0x4b9   : > { %v707_v9 = vmul.f32 %v1694_v8, %v702_v46  ;;  %v1696_v13 = vpop.eup %1695 }
 0x4ba   : > { %v1698_v19 = vpop.eup %1697 }
 0x4bb   : > { %708 = vst.msk [vmem:[#allocation5] sm:$0xff] %vm547_vm2, %v707_v9  ;;  %v1700_v23 = vpop.eup %1699 }
 0x4d8   : > { %v874_v14 = vpop.f32.mrf.mxu1 }
 0x4d9   : > { %v879_v16 = vmul.f32 %v1696_v13, %v874_v14 }
 0x4da   : > { %v1576_v17 = vpop.f32.mrf.mxu1 }
 0x4db   : > { %881 = vrot.lane.b32.xlu1 %v879_v16, %s1896_s15 }
 0x4dc   : > { %v1051_v20 = vpop.f32.mrf.mxu1 }
 0x4dd   : > { %v1056_v21 = vmul.f32 %v1698_v19, %v1051_v20 }
 0x4de   : > { %v1586_v22 = vpop.f32.mrf.mxu1 }
 0x4df   : > { %1058 = vrot.lane.b32.xlu0 %v1056_v21, %s1897_s18 }
 0x4e0   : > { %v1228_v24 = vpop.f32.mrf.mxu1 }
 0x4e1   : > { %v1233_v25 = vmul.f32 %v1700_v23, %v1228_v24 }
 0x4e2   : > { %v1596_v26 = vpop.f32.mrf.mxu1 }
 0x4e3   : > { %1235 = vrot.lane.b32.xlu1 %v1233_v25, %s1898_s22 }
 0x54d   : > { %v882_v27 = vpop.permute.xlu1 %881 }
 0x54e   : > { %885 = vst.msk [vmem:[#allocation5] sm:$0xff] %vm884_vm3, %v882_v27 }
 0x551   : > { %v1059_v28 = vpop.permute.xlu0 %1058 }
 0x552   : > { %1062 = vst.msk [vmem:[#allocation5] sm:$0xff] %vm1061_vm4, %v1059_v28 }
 0x555   : > { %v1236_v0 = vpop.permute.xlu1 %1235 }
 0x556   : > { %1239 = vst.msk [vmem:[#allocation5] sm:$0xff] %vm1238_vm5, %v1236_v0 }
 0x55d   : > { %v1240_v29 = vld [vmem:[#allocation5] sm:$0xff] }
 0x55e   : > { %1606 = vmatmul.mubr.msk.f32.vlgmr.msra.gmra.mxu0 %vm321_vm1, %v1240_v29 }
 0x61e   : > { %v1310_v30 = vpop.f32.mrf.mxu0 }
 0x61f   : > { %1314 = vst.msk [vmem:[%s298_s25] sm:$0xff] %vm321_vm1, %v1310_v30 }
 0x620   : > { %v1607_v31 = vpop.f32.mrf.mxu0 }
 0x621   : > { %1824 = shalt.err (!%p1821_p3)
}
 0x622   : > { %s1825_s12 = scalar_lea.hbm %s2229_s1, 128  ;;  %s1829_s23 = scalar_lea.hbm %s2277_s4, 256 }
 0x623   : > { %p1826_p4 = scmp.ne.s32.totalorder %s2229_s1, %s1825_s12  ;;  %p1830_p8 = scmp.lt.s32.totalorder %s2229_s1, %s2277_s4 }
 0x624   : > { %p1831_p6 = scmp.lt.s32.totalorder %s1829_s23, %s1825_s12 }
 0x625   : > { %p1827_p11 = pnand %p1826_p4, %p2309_p13 }
 0x626   : > { %p1832_p12 = por %p1831_p6, %p1830_p8 }
 0x627   : > { %p1828_p2 = pneg %p1827_p11 }
 0x629   : > { %p1833_p7 = pnand %p1832_p12, %p1828_p2 }
 0x62b   : > { %1836 = shalt.err (!%p1833_p7)
}
 0x62c   : > { %1618 = dma.vmem_to_hbm [thread:$0]  (%p2309_p13), %s2231_s27, 128, %s2229_s1, %s1316_s24  }
 0x62d PF: > { %s2310_s10 = sld [smem:[#allocation19_spill]] }
 0x62e   : > { %s2311_s8 = sld [smem:[#allocation23_spill]] }
 0x62f   : > { %s2312_s19 = sld [smem:[#allocation20_spill]] }
 0x633   : > { %s1341_s14 = sand.u32 1, %s2310_s10  }
 0x634   : > { %p2313_p1 = scmp.ne.s32.totalorder %s2311_s8, 0  ;;  %s1342_s15 = scalar_lea.sflag [#allocation8], %s1341_s14 }
 0x635   : > { %p2314_p5 = scmp.ge.s32.totalorder %s2312_s19, 2 }
 0x637   : > { %p1635_p0 = pnand %p2314_p5, %p2313_p1 }
 0x639   : > { %p1636_p9 = pneg %p1635_p0 }
 0x63b   : > { %1866 = dma.done.wait (%p1636_p9), %s1342_s15, 128  }
 0x63c   : > { %1868 = vsyncadd (%p1636_p9), %s1342_s15, 4294967168  ;;  %s2315_s18 = sld [smem:[#allocation21_spill]]  ;;  %s2317_s15 = smov %s1875_s16 }
 0x63d   : > { %s2316_s22 = sld [smem:[#allocation22_spill]]  ;;  %s2318_s16 = smov %s1879_s17 }
 0x642   : > { %p21_p10 = scmp.ge.s32.totalorder %s2315_s18, 4  }
 0x643   : > { %s2319_s17 = smov %s2316_s22 }
 0x644   :  { %23 = sbr.rel (!%p21_p10) target bundleno = 10 (0xa), region = 112 }
 0x649   :  { %1347 = vsyncpa [#allocation7], 1 }
 0x64a   :  { %1349 = vsyncpa [#allocation7 + $0x1], 1 }
 0x64b   :  { %1350 = vsyncpa [#allocation10], 1 }
 0x64c   :  { %1352 = vsyncpa [#allocation10 + $0x1], 1 }
 0x64d   :  { %1353 = vsyncpa [#allocation13], 1 }
 0x64e   :  { %1354 = vsyncpa [#allocation8], 1 }
 0x64f   :  { %1356 = vsyncpa [#allocation8 + $0x1], 1 }

</bundles_post_ra>
